<compile_context>
chip_gen: v7x
topology: tpu7x:2x2x1
jax: 0.10.0
libtpu: 0.0.40
codegen_flags: <defaults>
</compile_context>

<pallas_src>
import math
from functools import partial

import jax
import jax.numpy as jnp
from jax.experimental import pallas as pl
from jax.experimental.pallas import tpu as pltpu


# ----------------------------------------------------------------------------
# Tiling helpers (byte-targeted, dtype-aware, generation-aware)
# ----------------------------------------------------------------------------
def _cdiv(a, b):
    return (a + b - 1) // b


def _round_up(a, b):
    return _cdiv(a, b) * b


def _vmem_capacity_bytes():
    try:
        info = pltpu.get_tpu_info()
        for name in ("vmem_capacity_bytes", "vmem_size_bytes"):
            cap = getattr(info, name, None)
            if cap:
                return int(cap)
    except Exception:
        pass
    return 128 * 1024 * 1024  # v5e/v6e; the 4 MiB tile target below is v7x-safe anyway


_VMEM_CAP = _vmem_capacity_bytes()
# One input tile (two live copies due to double-buffering).  2-4 MiB is on the measured
# HBM-roofline plateau and keeps the double-buffered input at ~8 MiB on every generation.
_TILE_BYTES = max(2 * 1024 * 1024, min(4 * 1024 * 1024, _VMEM_CAP // 16))
_MIN_VMEM_LIMIT = 32 * 1024 * 1024


def _pick_rows(total_rows, row_bytes):
    """Rows per tile: byte target, rounded to 128 for lane-dense output stores."""
    rows = _TILE_BYTES // max(1, row_bytes)
    if rows >= 128:
        t = (rows // 128) * 128
        return min(t, _round_up(total_rows, 128))
    t = max(8, (rows // 8) * 8)
    return min(t, _round_up(total_rows, 8))


def _vmem_limit(footprint_bytes):
    limit = max(2 * footprint_bytes, _MIN_VMEM_LIMIT)
    limit = min(limit, (_VMEM_CAP * 3) // 4)
    return int(max(limit, footprint_bytes + 4 * 1024 * 1024))


# ----------------------------------------------------------------------------
# Linear head (out_size == 1)
# ----------------------------------------------------------------------------
def _linear_kernel(x_ref, w_ref, b_ref, o_ref, acc_ref, *, rem):
    # x_ref: (tm, th) VMEM   w_ref: (1, th) VMEM   b_ref: (1, 1) SMEM
    # o_ref: (1, 1, tm) VMEM (lane-dense, written on last H step)
    # acc_ref: (tm, 1) f32 VMEM scratch (reduction accumulator across the H grid axis)
    h = pl.program_id(1)
    nh = pl.num_programs(1)

    @pl.when(h == 0)
    def _init():
        acc_ref[...] = jnp.zeros_like(acc_ref)

    x = x_ref[...].astype(jnp.float32)
    w = w_ref[...].astype(jnp.float32)          # (1, th), broadcast over sublanes
    # VPU multiply + XLU lane reduction; an N=1 MXU matmul would waste 127/128 lanes.
    # (If bundle dumps ever show vreg spills for very large th, split this into a
    #  fori_loop over lane chunks — contingency per perf review, not applied blind.)
    prod = x * w
    if rem:  # ragged last H block: zero out lanes past H (static trace-time branch)
        lane = jax.lax.broadcasted_iota(jnp.int32, prod.shape, 1)
        limit = jnp.where(h == nh - 1, rem, prod.shape[1])
        prod = jnp.where(lane < limit, prod, 0.0)
    acc_ref[...] += jnp.sum(prod, axis=-1, keepdims=True)

    @pl.when(h == nh - 1)
    def _finalize():
        y = acc_ref[...] + b_ref[0, 0]                       # (tm, 1) f32
        # per-row scalars laid along lanes -> dense (unmasked) stores / writeback DMA
        o_ref[...] = jnp.transpose(y).reshape(o_ref.shape).astype(o_ref.dtype)


def _linear_tiling(M, H, itemsize):
    row_bytes = H * itemsize
    if 128 * row_bytes <= _TILE_BYTES:
        return _pick_rows(M, row_bytes), H               # full-H tiles (grid_h == 1)
    # large-H path: tile H as a reduction, keep >=128 rows so DMAs stay full-width
    tm = 128
    th = max(128, (_TILE_BYTES // (tm * itemsize)) // 128 * 128)
    return tm, th


def pallas_linear_out1(x, w, b):
    """x: (..., H), w: (H, 1), b: (1, 1) -> (...,)  (out_size == 1, squeezed)."""
    lead_shape = x.shape[:-1]
    H = x.shape[-1]
    x2 = x.reshape(-1, H)
    M = x2.shape[0]
    itemsize = x2.dtype.itemsize

    tm, th = _linear_tiling(M, H, itemsize)
    grid_m = _cdiv(M, tm)
    if grid_m == 1 and M > 128:                          # give v7x's 2nd TensorCore work
        tm = _round_up(_cdiv(M, 2), 128)
        grid_m = _cdiv(M, tm)
    grid_h = _cdiv(H, th)

    w2 = w.reshape(1, H).astype(jnp.float32)
    b2 = b.reshape(1, 1).astype(jnp.float32)

    footprint = (2 * tm * th * itemsize                  # double-buffered activation tiles
                 + 2 * th * w2.dtype.itemsize            # double-buffered weight tiles
                 + 2 * tm * x2.dtype.itemsize            # double-buffered output blocks
                 + tm * 4)                               # accumulator scratch

    out = pl.pallas_call(
        partial(_linear_kernel, rem=H % th),
        out_shape=jax.ShapeDtypeStruct((grid_m, 1, tm), x2.dtype),
        grid=(grid_m, grid_h),
        in_specs=[
            pl.BlockSpec((tm, th), lambda i, h: (i, h)),             # pipelined activations
            pl.BlockSpec((1, th), lambda i, h: (0, h)),              # weight row
            pl.BlockSpec(memory_space=pltpu.MemorySpace.SMEM),       # bias scalar in SMEM
        ],
        out_specs=pl.BlockSpec((1, 1, tm), lambda i, h: (i, 0, 0)),  # lane-dense slab
        scratch_shapes=[pltpu.VMEM((tm, 1), jnp.float32)],
        compiler_params=pltpu.CompilerParams(
            dimension_semantics=("parallel", "arbitrary"),           # M parallel, H reduction
            vmem_limit_bytes=_vmem_limit(footprint),
        ),
    )(x2, w2, b2)
    return out.reshape(-1)[:M].reshape(lead_shape)                   # squeeze(-1)


# ----------------------------------------------------------------------------
# HNA entropy
# ----------------------------------------------------------------------------
def _hna_kernel(s_ref, o_ref, *, m, log_coef_mean):
    # s_ref: (tb, n) samples sorted ascending along last axis.  o_ref: (1, 1, tb).
    s = s_ref[...].astype(jnp.float32)
    tb, n = s.shape

    first = s[:, 0:1]
    last = s[:, n - 1:n]
    if m >= n:
        s_hi = jnp.broadcast_to(last, (tb, n))
        s_lo = jnp.broadcast_to(first, (tb, n))
    else:
        # Clamped neighbours s[min(i+m, n-1)], s[max(i-m, 0)] via static lane slices +
        # edge broadcasts.  (pltpu.roll variant deferred — see header note.)
        s_hi = jnp.concatenate([s[:, m:], jnp.broadcast_to(last, (tb, m))], axis=-1)
        s_lo = jnp.concatenate([jnp.broadcast_to(first, (tb, m)), s[:, : n - m]], axis=-1)

    diff = jnp.maximum(s_hi - s_lo, 1e-8)
    # Coefficient term (1/n)*sum(log(n/(c_i*m))) is constant-folded at trace time; the
    # kernel does a single full-width log pass and one lane reduction.
    ent = jnp.sum(jnp.log(diff), axis=-1, keepdims=True) * (1.0 / n) + log_coef_mean
    o_ref[...] = jnp.transpose(ent).reshape(o_ref.shape).astype(o_ref.dtype)


def pallas_hna_entropy(samples, m=15):
    """HNA entropy estimator over the last axis of `samples` (shape (..., n)) -> (..., 1)."""
    # TODO(synk): sorting has no clean Pallas/Mosaic equivalent; jnp.sort stays in JAX glue.
    s_sorted = jnp.sort(samples, axis=-1)            # keep input dtype: no HBM upcast
    lead = s_sorted.shape[:-1]
    n = s_sorted.shape[-1]
    s2 = s_sorted.reshape(-1, n)
    B = s2.shape[0]
    itemsize = s2.dtype.itemsize

    tb = _pick_rows(B, n * itemsize)
    grid_b = _cdiv(B, tb)

    # (1/n) * sum_i log(n / (c_i * m)); c_i = 2 on interior indices m-1 <= i <= n-m-1.
    log_coef_mean = sum(
        math.log(n / ((2.0 if (m - 1 <= i <= n - m - 1) else 1.0) * m)) for i in range(n)
    ) / n

    footprint = 2 * tb * n * itemsize + 2 * tb * 4

    out = pl.pallas_call(
        partial(_hna_kernel, m=m, log_coef_mean=log_coef_mean),
        out_shape=jax.ShapeDtypeStruct((grid_b, 1, tb), jnp.float32),
        grid=(grid_b,),
        in_specs=[pl.BlockSpec((tb, n), lambda i: (i, 0))],
        out_specs=pl.BlockSpec((1, 1, tb), lambda i: (i, 0, 0)),     # lane-dense slab
        compiler_params=pltpu.CompilerParams(
            dimension_semantics=("parallel",),
            vmem_limit_bytes=_vmem_limit(footprint),
        ),
    )(s2)
    return out.reshape(-1)[:B].reshape(lead + (1,))


# ----------------------------------------------------------------------------
# Module port
# ----------------------------------------------------------------------------
class SampleDist:
    def __init__(self, samples):
        self.samples = samples

    def entropy(self):
        return pallas_hna_entropy(self.samples)

    @property
    def mean(self):
        return self.samples


class SampleHead:
    """JAX/Pallas port of the PyTorch SampleHead (out_size must be 1)."""

    def __init__(self, input_size, out_size, key):
        assert out_size == 1
        # nn.Linear default init: U(-1/sqrt(in), 1/sqrt(in)) for weight and bias.
        kw, kb = jax.random.split(key)
        bound = 1.0 / math.sqrt(input_size)
        self.w = jax.random.uniform(kw, (input_size, 1), jnp.float32, -bound, bound)
        self.b = jax.random.uniform(kb, (1, 1), jnp.float32, -bound, bound)

    def __call__(self, x):
        samples = pallas_linear_out1(x, self.w, self.b)
        return SampleDist(samples)


# ----------------------------------------------------------------------------
# Demo / smoke test
# ----------------------------------------------------------------------------
def _ref_hna(s, m=15):
    n = s.shape[-1]
    ss = jnp.sort(s, axis=-1)
    total = jnp.zeros(s.shape[:-1], jnp.float32)
    for i in range(n):
        c = 1.0 if (i < m - 1 or i > n - m - 1) else 2.0
        diff = ss[..., min(i + m, n - 1)] - ss[..., max(i - m, 0)]
        diff = jnp.maximum(diff, 1e-8)
        total = total + (1.0 / n) * jnp.log(n / (c * m) * diff)
    return total[..., None]


if __name__ == "__main__":
    B, S, H = 2, 8, 32  # batch, "sample" axis (seq), hidden = input_size
    key = jax.random.PRNGKey(0)
    kx, kp, ks = jax.random.split(key, 3)

    x = jax.random.normal(kx, (B, S, H), jnp.float32)
    head = SampleHead(H, 1, kp)

    dist = head(x)
    samples = jax.block_until_ready(dist.mean)        # (B, S)
    ent = jax.block_until_ready(dist.entropy())       # (B, 1)

    # References in plain JAX (match the PyTorch semantics).
    ref_samples = jnp.sum(x * head.w[:, 0], axis=-1) + head.b[0, 0]
    ref_ent = _ref_hna(ref_samples)

    assert samples.shape == (B, S) and ent.shape == (B, 1)
    assert jnp.allclose(samples, ref_samples, atol=1e-5, rtol=1e-5)
    assert jnp.allclose(ent, ref_ent, atol=1e-4, rtol=1e-4)

    # Also exercise the general (m < n) neighbour path of the HNA kernel.
    y = jax.random.normal(ks, (3, 40), jnp.float32)
    ent2 = jax.block_until_ready(pallas_hna_entropy(y))
    assert ent2.shape == (3, 1)
    assert jnp.allclose(ent2, _ref_hna(y), atol=1e-4, rtol=1e-4)

    print("KERNEL_OK")
</pallas_src>

<mosaic_0001>
module attributes {stable_mosaic.version = 11 : i64} {
  func.func @_linear_kernel(%arg0: i32, %arg1: i32, %arg2: memref<128x32xf32, #tpu.memory_space<vmem>>, %arg3: memref<1x32xf32, #tpu.memory_space<vmem>>, %arg4: memref<1x1xf32, #tpu.memory_space<smem>>, %arg5: memref<1x1x128xf32, #tpu.memory_space<vmem>>, %arg6: memref<128x1xf32, #tpu.memory_space<vmem>>) attributes {dimension_semantics = [#tpu.dimension_semantics<parallel>, #tpu.dimension_semantics<arbitrary>], iteration_bounds = array<i64: 1, 1>, scalar_prefetch = 0 : i64, scratch_operands = 1 : i64, tpu.core_type = #tpu.core_type<tc>, window_params = [{transform_indices = @transform_0, window_bounds = array<i64: 128, 32>}, {transform_indices = @transform_1, window_bounds = array<i64: 1, 32>}, {transform_indices = @transform_2, window_bounds = array<i64: 1, 1>}, {transform_indices = @transform_3, window_bounds = array<i64: 1, 1, 128>}]} {
    %c0_i32 = arith.constant 0 : i32
    %0 = arith.cmpi eq, %arg1, %c0_i32 : i32
    %1 = arith.extui %0 : i1 to i32
    %c0_i32_0 = arith.constant 0 : i32
    %2 = arith.cmpi ne, %1, %c0_i32_0 : i32
    scf.if %2 {
      %cst_10 = arith.constant 0.000000e+00 : f32
      %15 = vector.broadcast %cst_10 : f32 to vector<128x1xf32>
      %c0_11 = arith.constant 0 : index
      %c0_12 = arith.constant 0 : index
      %16 = vector.load %arg6[%c0_11, %c0_12] : memref<128x1xf32, #tpu.memory_space<vmem>>, vector<128x1xf32>
      tpu.vector_store %arg6[%c0_11, %c0_12], %15 {strides = array<i32>} : memref<128x1xf32, #tpu.memory_space<vmem>>, vector<128x1xf32>,
    } else {
    }
    %c0 = arith.constant 0 : index
    %c0_1 = arith.constant 0 : index
    %3 = vector.load %arg2[%c0, %c0_1] : memref<128x32xf32, #tpu.memory_space<vmem>>, vector<128x32xf32>
    %c0_2 = arith.constant 0 : index
    %c0_3 = arith.constant 0 : index
    %4 = vector.load %arg3[%c0_2, %c0_3] : memref<1x32xf32, #tpu.memory_space<vmem>>, vector<1x32xf32>
    %5 = vector.broadcast %4 : vector<1x32xf32> to vector<128x32xf32>
    %6 = arith.mulf %3, %5 : vector<128x32xf32>
    %c0_4 = arith.constant 0 : index
    %c0_5 = arith.constant 0 : index
    %7 = vector.load %arg6[%c0_4, %c0_5] : memref<128x1xf32, #tpu.memory_space<vmem>>, vector<128x1xf32>
    %cst = arith.constant dense<0.000000e+00> : vector<128xf32>
    %8 = vector.multi_reduction <add>, %6, %cst [1] : vector<128x32xf32> to vector<128xf32>
    %9 = vector.shape_cast %8 : vector<128xf32> to vector<128x1xf32>
    %10 = arith.addf %7, %9 : vector<128x1xf32>
    %c0_6 = arith.constant 0 : index
    %c0_7 = arith.constant 0 : index
    %11 = vector.load %arg6[%c0_6, %c0_7] : memref<128x1xf32, #tpu.memory_space<vmem>>, vector<128x1xf32>
    tpu.vector_store %arg6[%c0_6, %c0_7], %10 {strides = array<i32>} : memref<128x1xf32, #tpu.memory_space<vmem>>, vector<128x1xf32>,
    %c0_i32_8 = arith.constant 0 : i32
    %12 = arith.cmpi eq, %arg1, %c0_i32_8 : i32
    %13 = arith.extui %12 : i1 to i32
    %c0_i32_9 = arith.constant 0 : i32
    %14 = arith.cmpi ne, %13, %c0_i32_9 : i32
    scf.if %14 {
      %c0_10 = arith.constant 0 : index
      %c0_11 = arith.constant 0 : index
      %15 = vector.load %arg6[%c0_10, %c0_11] : memref<128x1xf32, #tpu.memory_space<vmem>>, vector<128x1xf32>
      %c0_12 = arith.constant 0 : index
      %c0_13 = arith.constant 0 : index
      %16 = memref.load %arg4[%c0_12, %c0_13] : memref<1x1xf32, #tpu.memory_space<smem>>
      %17 = vector.broadcast %16 : f32 to vector<128x1xf32>
      %18 = arith.addf %15, %17 : vector<128x1xf32>
      %19 = tpu.transpose %18, [1, 0] : vector<128x1xf32> -> vector<1x128xf32>
      %20 = vector.shape_cast %19 : vector<1x128xf32> to vector<1x1x128xf32>
      %c0_14 = arith.constant 0 : index
      %c0_15 = arith.constant 0 : index
      %c0_16 = arith.constant 0 : index
      %21 = vector.load %arg5[%c0_14, %c0_15, %c0_16] : memref<1x1x128xf32, #tpu.memory_space<vmem>>, vector<1x1x128xf32>
      tpu.vector_store %arg5[%c0_14, %c0_15, %c0_16], %20 {strides = array<i32>} : memref<1x1x128xf32, #tpu.memory_space<vmem>>, vector<1x1x128xf32>,
    } else {
    }
    return
  }
  func.func @transform_0(%arg0: i32, %arg1: i32) -> (i32, i32) {
    %c0_i32 = arith.constant 0 : i32
    return %arg0, %arg1 : i32, i32
  }
  func.func @transform_1(%arg0: i32, %arg1: i32) -> (i32, i32) {
    %c0_i32 = arith.constant 0 : i32
    %c0_i32_0 = arith.constant 0 : i32
    return %c0_i32, %arg1 : i32, i32
  }
  func.func @transform_2(%arg0: i32, %arg1: i32) -> (i32, i32) {
    %c0_i32 = arith.constant 0 : i32
    %c0_i32_0 = arith.constant 0 : i32
    %c0_i32_1 = arith.constant 0 : i32
    return %c0_i32, %c0_i32_0 : i32, i32
  }
  func.func @transform_3(%arg0: i32, %arg1: i32) -> (i32, i32, i32) {
    %c0_i32 = arith.constant 0 : i32
    %c0_i32_0 = arith.constant 0 : i32
    %c0_i32_1 = arith.constant 0 : i32
    return %arg0, %c0_i32, %c0_i32_0 : i32, i32, i32
  }
}

</mosaic_0001>

<bundles_post_ra>
// kernel: tpu_custom_call.1
= control target key start
LH: loop header
LB: loop body
LE: loop exit
PB: predicated region body
PF: predicated region fallthrough
CT: control target
= control target key end

     0   :  { %9 = vsyncpa [#allocation5], 0  ;;  %s448_s0 = inlined_call_operand.hbm [shape: f32[16,32], index: 0, kind: input, shape index: {}]   ;;  %s449_s1 = inlined_call_operand.vmem [shape: f32[1,32], index: 1, kind: input, shape index: {}]   ;;  %s450_s2 = inlined_call_operand.<no memory space> [shape: f32[1,1], index: 2, kind: input, shape index: {}]   ;;  %s451_s3 = inlined_call_operand.hbm [shape: f32[1,1,128], index: 3, kind: output, shape index: {}]  }
   0x1   :  { %10 = vsyncpa [#allocation6], 0 }
   0x2   :  { %15 = vsyncadd [#allocation5], 1792  ;;  %s327_s12 = smov [#allocation4]   ;;  %s279_s16 = scalar_lea.hbm %s448_s0, 256 }
   0x3   :  { %s16_s13 = sshll.u32 %s327_s12, 4  ;;  %p280_p0 = scmp.ne.s32.totalorder %s448_s0, %s279_s16  ;;  %s17_s13 = int_to_ptr.vmem [resolvable:$true] %s16_s13 }
   0x4   :  { %p283_p1 = scmp.lt.u32.totalorder %s279_s16, %s448_s0 }
   0x6   :  { %p285_p2 = pnand %p283_p1, %p280_p0 }
   0x8   :  { %288 = shalt.err (!%p285_p2)
}
   0x9   :  { %s289_s21 = scalar_lea.vmem %s17_s13, 256  ;;  %s293_s22 = scalar_lea.vmem %s17_s13, 2048 }
   0xa   :  { %p290_p3 = scmp.ne.s32.totalorder %s17_s13, %s289_s21  ;;  %p294_p4 = scmp.lt.s32.totalorder %s17_s13, %s17_s13 }
   0xb   :  { %p295_p5 = scmp.lt.s32.totalorder %s293_s22, %s289_s21 }
   0xd   :  { %p296_p6 = por %p295_p5, %p294_p4 }
   0xf   :  { %p297_p7 = pnand %p296_p6, %p290_p3 }
  0x11   :  { %300 = shalt.err (!%p297_p7)
}
  0x12   :  { %s328_s23 = smov 128   ;;  %s329_s24 = smov 8  }
  0x13   :  { %22 = dma.hbm_to_vmem [thread:$0]  %s448_s0, 256, %s17_s13, [#allocation5], %s328_s23, %s328_s23, %s329_s24  }
  0x14   :  { %323 = dma.done.wait [#allocation5], 2048  }
  0x15   :  { %324 = vsyncadd [#allocation5], 4294965248  ;;  %vm34_vm0 = vcmask 7168   ;;  %v330_v0 = vmov 0.0   ;;  %v51_v1 = vld [vmem:[#allocation4] sm:$0xff]  ;;  %vm106_vm1 = vcmask 261120  }
  0x16   :  { %35 = vst.msk [vmem:[#allocation2] sm:$0xff] %vm34_vm0, %v330_v0  ;;  %36 = vst.msk [vmem:[#allocation2 + $0x8] sm:$0xff] %vm34_vm0, %v330_v0  ;;  %v273_v2 = vld [vmem:[%s449_s1] ss:$0 sm:$0xff]  ;;  %v52_v3 = vld [vmem:[#allocation4 + $0x8] sm:$0xff] }
  0x17   :  { %37 = vst.msk [vmem:[#allocation2 + $0x10] sm:$0xff] %vm34_vm0, %v330_v0  ;;  %38 = vst.msk [vmem:[#allocation2 + $0x18] sm:$0xff] %vm34_vm0, %v330_v0  ;;  %v74_v4 = vmul.f32 %v273_v2, %v51_v1  ;;  %v75_v5 = vmul.f32 %v273_v2, %v52_v3  ;;  %v53_v6 = vld [vmem:[#allocation4 + $0x10] sm:$0xff]  ;;  %v54_v7 = vld [vmem:[#allocation4 + $0x18] sm:$0xff] }
  0x18   :  { %39 = vst.msk [vmem:[#allocation2 + $0x20] sm:$0xff] %vm34_vm0, %v330_v0  ;;  %40 = vst.msk [vmem:[#allocation2 + $0x28] sm:$0xff] %vm34_vm0, %v330_v0  ;;  %v76_v8 = vmul.f32 %v273_v2, %v53_v6  ;;  %v77_v9 = vmul.f32 %v273_v2, %v54_v7  ;;  %v55_v10 = vld [vmem:[#allocation4 + $0x20] sm:$0xff]  ;;  %v56_v12 = vld [vmem:[#allocation4 + $0x28] sm:$0xff] }
  0x19   :  { %41 = vst.msk [vmem:[#allocation2 + $0x30] sm:$0xff] %vm34_vm0, %v330_v0  ;;  %42 = vst.msk [vmem:[#allocation2 + $0x38] sm:$0xff] %vm34_vm0, %v330_v0  ;;  %v107_v11 = vsel %vm106_vm1, %v74_v4, 0.0  ;;  %v110_v14 = vsel %vm106_vm1, %v75_v5, 0.0  ;;  %v78_v15 = vmul.f32 %v273_v2, %v55_v10  ;;  %v79_v17 = vmul.f32 %v273_v2, %v56_v12  ;;  %v57_v18 = vld [vmem:[#allocation4 + $0x30] sm:$0xff]  ;;  %v58_v19 = vld [vmem:[#allocation4 + $0x38] sm:$0xff] }
  0x1a   :  { %43 = vst.msk [vmem:[#allocation2 + $0x40] sm:$0xff] %vm34_vm0, %v330_v0  ;;  %44 = vst.msk [vmem:[#allocation2 + $0x48] sm:$0xff] %vm34_vm0, %v330_v0  ;;  %108 = vadd.xlane.f32.xlu0 %v107_v11  ;;  %v113_v13 = vsel %vm106_vm1, %v76_v8, 0.0  ;;  %v116_v16 = vsel %vm106_vm1, %v77_v9, 0.0  ;;  %v80_v21 = vmul.f32 %v273_v2, %v57_v18  ;;  %v81_v23 = vmul.f32 %v273_v2, %v58_v19  ;;  %v59_v24 = vld [vmem:[#allocation4 + $0x40] sm:$0xff]  ;;  %v60_v25 = vld [vmem:[#allocation4 + $0x48] sm:$0xff] }
  0x1b   :  { %45 = vst.msk [vmem:[#allocation2 + $0x50] sm:$0xff] %vm34_vm0, %v330_v0  ;;  %46 = vst.msk [vmem:[#allocation2 + $0x58] sm:$0xff] %vm34_vm0, %v330_v0  ;;  %114 = vadd.xlane.f32.xlu1 %v113_v13  ;;  %v119_v20 = vsel %vm106_vm1, %v78_v15, 0.0  ;;  %v122_v22 = vsel %vm106_vm1, %v79_v17, 0.0  ;;  %v82_v27 = vmul.f32 %v273_v2, %v59_v24  ;;  %v83_v29 = vmul.f32 %v273_v2, %v60_v25  ;;  %v61_v30 = vld [vmem:[#allocation4 + $0x50] sm:$0xff]  ;;  %v62_v31 = vld [vmem:[#allocation4 + $0x58] sm:$0xff] }
  0x1c   :  { %47 = vst.msk [vmem:[#allocation2 + $0x60] sm:$0xff] %vm34_vm0, %v330_v0  ;;  %48 = vst.msk [vmem:[#allocation2 + $0x68] sm:$0xff] %vm34_vm0, %v330_v0  ;;  %v125_v26 = vsel %vm106_vm1, %v80_v21, 0.0  ;;  %v128_v28 = vsel %vm106_vm1, %v81_v23, 0.0  ;;  %v84_v33 = vmul.f32 %v273_v2, %v61_v30  ;;  %v85_v35 = vmul.f32 %v273_v2, %v62_v31  ;;  %v63_v36 = vld [vmem:[#allocation4 + $0x60] sm:$0xff]  ;;  %v64_v37 = vld [vmem:[#allocation4 + $0x68] sm:$0xff] }
  0x1d   :  { %49 = vst.msk [vmem:[#allocation2 + $0x70] sm:$0xff] %vm34_vm0, %v330_v0  ;;  %50 = vst.msk [vmem:[#allocation2 + $0x78] sm:$0xff] %vm34_vm0, %v330_v0  ;;  %v131_v32 = vsel %vm106_vm1, %v82_v27, 0.0  ;;  %v134_v34 = vsel %vm106_vm1, %v83_v29, 0.0  ;;  %v86_v39 = vmul.f32 %v273_v2, %v63_v36  ;;  %v87_v41 = vmul.f32 %v273_v2, %v64_v37  ;;  %v65_v42 = vld [vmem:[#allocation4 + $0x70] sm:$0xff]  ;;  %v66_v43 = vld [vmem:[#allocation4 + $0x78] sm:$0xff] }
  0x1e   :  { %111 = vadd.xlane.f32.xlu0 %v110_v14  ;;  %v137_v38 = vsel %vm106_vm1, %v84_v33, 0.0  ;;  %v140_v40 = vsel %vm106_vm1, %v85_v35, 0.0  ;;  %v88_v45 = vmul.f32 %v273_v2, %v65_v42  ;;  %v89_v47 = vmul.f32 %v273_v2, %v66_v43  ;;  %v90_v50 = vld [vmem:[#allocation2] sm:$0xff]  ;;  %v92_v51 = vld [vmem:[#allocation2 + $0x10] sm:$0xff]  ;;  %v91_v55 = vld [vmem:[#allocation2 + $0x8] sm:$0xff] }
  0x1f   :  { %117 = vadd.xlane.f32.xlu1 %v116_v16  ;;  %v143_v44 = vsel %vm106_vm1, %v86_v39, 0.0  ;;  %v146_v46 = vsel %vm106_vm1, %v87_v41, 0.0  ;;  %v93_v57 = vld [vmem:[#allocation2 + $0x18] sm:$0xff]  ;;  %v94_v62 = vld [vmem:[#allocation2 + $0x20] sm:$0xff]  ;;  %v95_v63 = vld [vmem:[#allocation2 + $0x28] sm:$0xff]  ;;  %v406_v0 = vstv %s450_s2  ;;  %s331_s2 = smov [#allocation7]  }
  0x20   :  { %v149_v48 = vsel %vm106_vm1, %v88_v45, 0.0  ;;  %v152_v49 = vsel %vm106_vm1, %v89_v47, 0.0  ;;  %v96_v6 = vld [vmem:[#allocation2 + $0x30] sm:$0xff]  ;;  %v97_v8 = vld [vmem:[#allocation2 + $0x38] sm:$0xff]  ;;  %s264_s29 = sshll.u32 %s331_s2, 4  ;;  %s265_s29 = int_to_ptr.vmem [resolvable:$true] %s264_s29 }
  0x21   :  { %v98_v15 = vld [vmem:[#allocation2 + $0x40] sm:$0xff]  ;;  %v99_v17 = vld [vmem:[#allocation2 + $0x48] sm:$0xff]  ;;  %s301_s30 = scalar_lea.vmem %s265_s29, 16  ;;  %s305_s4 = scalar_lea.vmem %s265_s29, 32 }
  0x22   :  { %120 = vadd.xlane.f32.xlu0 %v119_v20  ;;  %v100_v24 = vld [vmem:[#allocation2 + $0x50] sm:$0xff]  ;;  %v101_v25 = vld [vmem:[#allocation2 + $0x58] sm:$0xff]  ;;  %p302_p8 = scmp.ne.s32.totalorder %s265_s29, %s301_s30  ;;  %p306_p9 = scmp.lt.s32.totalorder %s265_s29, %s265_s29 }
  0x23   :  { %123 = vadd.xlane.f32.xlu1 %v122_v22  ;;  %v103_v33 = vld [vmem:[#allocation2 + $0x68] sm:$0xff]  ;;  %p307_p10 = scmp.lt.s32.totalorder %s305_s4, %s301_s30 }
  0x24   :  { %v105_v41 = vld [vmem:[#allocation2 + $0x78] sm:$0xff] }
  0x25   :  { %p308_p11 = por %p307_p10, %p306_p9 }
  0x26   :  { %126 = vadd.xlane.f32.xlu0 %v125_v26 }
  0x27   :  { %129 = vadd.xlane.f32.xlu1 %v128_v28  ;;  %p309_p12 = pnand %p308_p11, %p302_p8 }
  0x2a   :  { %132 = vadd.xlane.f32.xlu0 %v131_v32  ;;  %v102_v32 = vld [vmem:[#allocation2 + $0x60] sm:$0xff] }
  0x2b   :  { %135 = vadd.xlane.f32.xlu1 %v134_v34 }
  0x2e   :  { %138 = vadd.xlane.f32.xlu0 %v137_v38 }
  0x2f   :  { %141 = vadd.xlane.f32.xlu1 %v140_v40  ;;  %v104_v40 = vld [vmem:[#allocation2 + $0x70] sm:$0xff] }
  0x32   :  { %144 = vadd.xlane.f32.xlu0 %v143_v44 }
  0x33   :  { %147 = vadd.xlane.f32.xlu1 %v146_v46 }
  0x36   :  { %150 = vadd.xlane.f32.xlu0 %v149_v48 }
  0x37   :  { %153 = vadd.xlane.f32.xlu1 %v152_v49 }
  0xa7   :  { %v109_v52 = vpop.xlane.xlu0 %108 }
  0xa8   :  { %v155_v53 = vadd.f32 %v109_v52, %v90_v50  ;;  %v115_v54 = vpop.xlane.xlu1 %114 }
  0xa9   :  { %v157_v56 = vadd.f32 %v115_v54, %v92_v51 }
  0xaa   :  { %172 = vst.msk [vmem:[#allocation2] sm:$0xff] %vm34_vm0, %v155_v53 }
  0xab   :  { %v112_v58 = vpop.xlane.xlu0 %111  ;;  %174 = vst.msk [vmem:[#allocation2 + $0x10] sm:$0xff] %vm34_vm0, %v157_v56 }
  0xac   :  { %v156_v59 = vadd.f32 %v112_v58, %v91_v55  ;;  %v118_v60 = vpop.xlane.xlu1 %117 }
  0xad   :  { %v158_v61 = vadd.f32 %v118_v60, %v93_v57 }
  0xae   :  { %173 = vst.msk [vmem:[#allocation2 + $0x8] sm:$0xff] %vm34_vm0, %v156_v59 }
  0xaf   :  { %175 = vst.msk [vmem:[#allocation2 + $0x18] sm:$0xff] %vm34_vm0, %v158_v61  ;;  %v121_v1 = vpop.xlane.xlu0 %120 }
  0xb0   :  { %v159_v2 = vadd.f32 %v121_v1, %v94_v62  ;;  %v124_v3 = vpop.xlane.xlu1 %123 }
  0xb1   :  { %v191_v4 = vld [vmem:[#allocation2] sm:$0xff]  ;;  %v160_v5 = vadd.f32 %v124_v3, %v95_v63 }
  0xb2   :  { %v209_v7 = vadd.f32 %v406_v0, %v191_v4  ;;  %176 = vst.msk [vmem:[#allocation2 + $0x20] sm:$0xff] %vm34_vm0, %v159_v2  ;;  %v193_v13 = vld [vmem:[#allocation2 + $0x10] sm:$0xff] }
  0xb3   :  { %177 = vst.msk [vmem:[#allocation2 + $0x28] sm:$0xff] %vm34_vm0, %v160_v5  ;;  %v127_v9 = vpop.xlane.xlu0 %126  ;;  %v211_v19 = vadd.f32 %v406_v0, %v193_v13 }
  0xb4   :  { %225 = vxpose.xlu0.b32.start [1/16] (narrow) %v209_v7, 8  ;;  %v161_v10 = vadd.f32 %v127_v9, %v96_v6  ;;  %v130_v11 = vpop.xlane.xlu1 %129 }
  0xb5   :  { %v192_v12 = vld [vmem:[#allocation2 + $0x8] sm:$0xff]  ;;  %v162_v14 = vadd.f32 %v130_v11, %v97_v8 }
  0xb6   :  { %v210_v16 = vadd.f32 %v406_v0, %v192_v12  ;;  %178 = vst.msk [vmem:[#allocation2 + $0x30] sm:$0xff] %vm34_vm0, %v161_v10  ;;  %v194_v22 = vld [vmem:[#allocation2 + $0x18] sm:$0xff] }
  0xb7   :  { %179 = vst.msk [vmem:[#allocation2 + $0x38] sm:$0xff] %vm34_vm0, %v162_v14  ;;  %v133_v18 = vpop.xlane.xlu0 %132  ;;  %v212_v27 = vadd.f32 %v406_v0, %v194_v22 }
  0xb8   :  { %226 = vxpose.xlu0.b32.cont [2/16] (narrow) %v210_v16, 8  ;;  %v163_v20 = vadd.f32 %v133_v18, %v98_v15  ;;  %v136_v21 = vpop.xlane.xlu1 %135 }
  0xb9   :  { %v164_v23 = vadd.f32 %v136_v21, %v99_v17  ;;  %v195_v30 = vld [vmem:[#allocation2 + $0x20] sm:$0xff] }
  0xba   :  { %180 = vst.msk [vmem:[#allocation2 + $0x40] sm:$0xff] %vm34_vm0, %v163_v20  ;;  %v213_v35 = vadd.f32 %v406_v0, %v195_v30  ;;  %v196_v38 = vld [vmem:[#allocation2 + $0x28] sm:$0xff] }
  0xbb   :  { %181 = vst.msk [vmem:[#allocation2 + $0x48] sm:$0xff] %vm34_vm0, %v164_v23  ;;  %v139_v26 = vpop.xlane.xlu0 %138  ;;  %v214_v43 = vadd.f32 %v406_v0, %v196_v38 }
  0xbc   :  { %227 = vxpose.xlu0.b32.cont [3/16] (narrow) %v211_v19, 8  ;;  %v165_v28 = vadd.f32 %v139_v26, %v100_v24  ;;  %v142_v29 = vpop.xlane.xlu1 %141 }
  0xbd   :  { %v166_v31 = vadd.f32 %v142_v29, %v101_v25  ;;  %v197_v46 = vld [vmem:[#allocation2 + $0x30] sm:$0xff] }
  0xbe   :  { %182 = vst.msk [vmem:[#allocation2 + $0x50] sm:$0xff] %vm34_vm0, %v165_v28  ;;  %v215_v48 = vadd.f32 %v406_v0, %v197_v46  ;;  %v198_v49 = vld [vmem:[#allocation2 + $0x38] sm:$0xff] }
  0xbf   :  { %183 = vst.msk [vmem:[#allocation2 + $0x58] sm:$0xff] %vm34_vm0, %v166_v31  ;;  %v145_v34 = vpop.xlane.xlu0 %144  ;;  %v216_v50 = vadd.f32 %v406_v0, %v198_v49 }
  0xc0   :  { %228 = vxpose.xlu0.b32.cont [4/16] (narrow) %v212_v27, 8  ;;  %v167_v36 = vadd.f32 %v145_v34, %v102_v32  ;;  %v148_v37 = vpop.xlane.xlu1 %147 }
  0xc1   :  { %v168_v39 = vadd.f32 %v148_v37, %v103_v33  ;;  %v199_v51 = vld [vmem:[#allocation2 + $0x40] sm:$0xff] }
  0xc2   :  { %184 = vst.msk [vmem:[#allocation2 + $0x60] sm:$0xff] %vm34_vm0, %v167_v36  ;;  %v217_v52 = vadd.f32 %v406_v0, %v199_v51  ;;  %v200_v53 = vld [vmem:[#allocation2 + $0x48] sm:$0xff] }
  0xc3   :  { %185 = vst.msk [vmem:[#allocation2 + $0x68] sm:$0xff] %vm34_vm0, %v168_v39  ;;  %v151_v42 = vpop.xlane.xlu0 %150  ;;  %v218_v54 = vadd.f32 %v406_v0, %v200_v53 }
  0xc4   :  { %229 = vxpose.xlu0.b32.cont [5/16] (narrow) %v213_v35, 8  ;;  %v169_v44 = vadd.f32 %v151_v42, %v104_v40  ;;  %v154_v45 = vpop.xlane.xlu1 %153 }
  0xc5   :  { %v170_v47 = vadd.f32 %v154_v45, %v105_v41  ;;  %v201_v55 = vld [vmem:[#allocation2 + $0x50] sm:$0xff] }
  0xc6   :  { %186 = vst.msk [vmem:[#allocation2 + $0x70] sm:$0xff] %vm34_vm0, %v169_v44  ;;  %v219_v56 = vadd.f32 %v406_v0, %v201_v55  ;;  %v202_v57 = vld [vmem:[#allocation2 + $0x58] sm:$0xff] }
  0xc7   :  { %187 = vst.msk [vmem:[#allocation2 + $0x78] sm:$0xff] %vm34_vm0, %v170_v47  ;;  %v220_v58 = vadd.f32 %v406_v0, %v202_v57 }
  0xc8   :  { %230 = vxpose.xlu0.b32.cont [6/16] (narrow) %v214_v43, 8 }
  0xc9   :  { %v203_v59 = vld [vmem:[#allocation2 + $0x60] sm:$0xff] }
  0xca   :  { %v221_v60 = vadd.f32 %v406_v0, %v203_v59  ;;  %v204_v61 = vld [vmem:[#allocation2 + $0x68] sm:$0xff] }
  0xcb   :  { %v222_v62 = vadd.f32 %v406_v0, %v204_v61 }
  0xcc   :  { %231 = vxpose.xlu0.b32.cont [7/16] (narrow) %v215_v48, 8 }
  0xcd   :  { %v205_v63 = vld [vmem:[#allocation2 + $0x70] sm:$0xff] }
  0xce   :  { %v223_v1 = vadd.f32 %v406_v0, %v205_v63  ;;  %v206_v2 = vld [vmem:[#allocation2 + $0x78] sm:$0xff] }
  0xcf   :  { %v224_v3 = vadd.f32 %v406_v0, %v206_v2 }
  0xd0   :  { %232 = vxpose.xlu0.b32.cont [8/16] (narrow) %v216_v50, 8 }
  0xd4   :  { %233 = vxpose.xlu0.b32.cont [9/16] (narrow) %v217_v52, 8 }
  0xd8   :  { %234 = vxpose.xlu0.b32.cont [10/16] (narrow) %v218_v54, 8 }
  0xdc   :  { %235 = vxpose.xlu0.b32.cont [11/16] (narrow) %v219_v56, 8 }
  0xe0   :  { %236 = vxpose.xlu0.b32.cont [12/16] (narrow) %v220_v58, 8 }
  0xe4   :  { %237 = vxpose.xlu0.b32.cont [13/16] (narrow) %v221_v60, 8 }
  0xe8   :  { %238 = vxpose.xlu0.b32.cont [14/16] (narrow) %v222_v62, 8 }
  0xec   :  { %239 = vxpose.xlu0.b32.cont [15/16] (narrow) %v223_v1, 8 }
  0xf0   :  { %240 = vxpose.xlu0.b32.end [16/16] (narrow) %v224_v3, 8 }
 0x134   :  { %v241_v4 = vpop.trf.xlu0 }
 0x135   :  { %257 = vst [vmem:[#allocation7] sm:$0x1] %v241_v4 }
 0x136   :  { %312 = shalt.err (!%p309_p12)
}
 0x137   :  { %s313_s7 = scalar_lea.hbm %s451_s3, 16 }
 0x138   :  { %p314_p13 = scmp.ne.s32.totalorder %s451_s3, %s313_s7  ;;  %p317_p0 = scmp.lt.u32.totalorder %s313_s7, %s451_s3 }
 0x13a   :  { %p319_p1 = pnand %p317_p0, %p314_p13 }
 0x13c   :  { %322 = shalt.err (!%p319_p1)
}
 0x13d   :  { %267 = dma.vmem_to_hbm [thread:$0]  %s265_s29, 16, %s451_s3, [#allocation6]  }
 0x13e   :  { %325 = dma.done.wait [#allocation6], 16  }
 0x13f   :  { %326 = vsyncadd [#allocation6], 4294967280 }
 0x140   :  { %271 = vsyncpa [#allocation5], 1 }
 0x141   :  { %272 = vsyncpa [#allocation6], 1 }

</bundles_post_ra>
